<compile_context>
chip_gen: v5e
topology: v5e:2x2
jax: 0.10.0
libtpu: 0.0.40
codegen_flags: <defaults>
</compile_context>

<pallas_src>
import functools
import math

import jax
import jax.numpy as jnp
from jax import lax
from jax.experimental import pallas as pl
from jax.experimental.pallas import tpu as pltpu

# Finite stand-in for -inf: identical softmax result whenever a row has >= 1
# unmasked key, and avoids NaN/Inf blowup for fully-masked rows.
_NEG_INF = -1e30


def _sdpa_kernel(*refs, scale, has_mask):
    if has_mask:
        q_ref, k_ref, v_ref, mask_ref, ctx_ref, attn_ref = refs
    else:
        q_ref, k_ref, v_ref, ctx_ref, attn_ref = refs
        mask_ref = None

    q = q_ref[0]          # [tq, D]
    k = k_ref[0]          # [Lk, D]
    v = v_ref[0]          # [Lk, Dv]

    # Fold the scale into q: tq*D multiplies instead of tq*Lk, same math.
    if scale:
        q = q * jnp.asarray(scale, dtype=q.dtype)

    # Q @ K^T on the MXU without an explicit transpose: contract over D.
    scores = lax.dot_general(
        q, k,
        dimension_numbers=(((1,), (1,)), ((), ())),
        preferred_element_type=jnp.float32)          # [tq, Lk] f32

    if has_mask:
        scores = jnp.where(mask_ref[0] != 0, jnp.float32(_NEG_INF), scores)

    # Numerically stable softmax over the key axis (f32 math).
    m = jnp.max(scores, axis=-1, keepdims=True)
    e = jnp.exp(scores - m)
    denom = jnp.sum(e, axis=-1, keepdims=True)
    p = e * pl.reciprocal(denom, approx=True)        # divide on the EUP slot

    # context = P @ V (cast P to v.dtype so bf16 models hit the bf16 MXU path).
    ctx = jnp.dot(p.astype(v.dtype), v, preferred_element_type=jnp.float32)

    attn_ref[0] = p.astype(attn_ref.dtype)
    ctx_ref[0] = ctx.astype(ctx_ref.dtype)


def _pick_q_tile(l_q, l_k):
    """Largest q tile (multiple of 32, dividing L_q) whose f32 [tq, L_k]
    intermediates stay comfortably inside scoped VMEM on every TPU gen
    (including v7x's 64 MiB)."""
    if l_q <= 256:
        return l_q
    # ~6 live f32 copies of the [tq, L_k] slab (scores/e/p + buffered attn out).
    budget_rows = max(32, (24 * 1024 * 1024) // (max(l_k, 1) * 4 * 6))
    cap = min(512, budget_rows, l_q)
    cap -= cap % 32
    for t in range(cap, 31, -32):
        if l_q % t == 0:
            return t
    return l_q  # ragged L_q: fall back to a single full-length tile


def scaled_dot_product_attention(q, k, v, scale=None, attn_mask=None):
    """q: [B, L_q, D], k: [B, L_k, D], v: [B, L_k, D_v],
    attn_mask: optional bool/int [B, L_q, L_k] (True/nonzero == masked out).
    `scale` must be a static Python scalar (as in the PyTorch module)."""
    B, Lq, D = q.shape
    _, Lk, _ = k.shape
    Dv = v.shape[-1]

    has_mask = attn_mask is not None
    tq = _pick_q_tile(Lq, Lk)
    n_q = Lq // tq

    kernel = functools.partial(_sdpa_kernel, scale=scale, has_mask=has_mask)

    in_specs = [
        pl.BlockSpec((1, tq, D), lambda b, i: (b, i, 0)),
        pl.BlockSpec((1, Lk, D), lambda b, i: (b, 0, 0)),
        pl.BlockSpec((1, Lk, Dv), lambda b, i: (b, 0, 0)),
    ]
    inputs = [q, k, v]
    if has_mask:
        in_specs.append(pl.BlockSpec((1, tq, Lk), lambda b, i: (b, i, 0)))
        inputs.append(attn_mask.astype(jnp.int8))  # 1 byte/elem instead of 4

    grid_spec = pltpu.PrefetchScalarGridSpec(
        num_scalar_prefetch=0,
        grid=(B, n_q),
        in_specs=in_specs,
        out_specs=[
            pl.BlockSpec((1, tq, Dv), lambda b, i: (b, i, 0)),
            pl.BlockSpec((1, tq, Lk), lambda b, i: (b, i, 0)),
        ],
    )

    ctx, attn = pl.pallas_call(
        kernel,
        grid_spec=grid_spec,
        out_shape=(
            jax.ShapeDtypeStruct((B, Lq, Dv), q.dtype),
            jax.ShapeDtypeStruct((B, Lq, Lk), q.dtype),  # probs in model dtype
        ),
        compiler_params=pltpu.CompilerParams(
            dimension_semantics=("parallel", "parallel"),
            vmem_limit_bytes=64 * 1024 * 1024,
        ),
    )(*inputs)
    return ctx, attn


def _reference(q, k, v, scale=None, attn_mask=None):
    scores = jnp.einsum("bqd,bkd->bqk", q.astype(jnp.float32), k.astype(jnp.float32))
    if scale:
        scores = scores * scale
    if attn_mask is not None:
        scores = jnp.where(attn_mask, -jnp.inf, scores)
    p = jax.nn.softmax(scores, axis=2)
    ctx = jnp.einsum("bqk,bkd->bqd", p, v.astype(jnp.float32))
    return ctx.astype(q.dtype), p.astype(q.dtype)


if __name__ == "__main__":
    B, Lq, Lk, D, Dv = 2, 8, 8, 32, 32
    key = jax.random.PRNGKey(0)
    kq, kk, kv = jax.random.split(key, 3)
    q = jax.random.normal(kq, (B, Lq, D), dtype=jnp.float32)
    k = jax.random.normal(kk, (B, Lk, D), dtype=jnp.float32)
    v = jax.random.normal(kv, (B, Lk, Dv), dtype=jnp.float32)

    scale = 1.0 / math.sqrt(D)
    # Causal-style mask (True == masked); every row keeps >= 1 unmasked entry.
    attn_mask = jnp.triu(jnp.ones((Lq, Lk), dtype=bool), k=1)[None].repeat(B, axis=0)

    # Masked path.
    ctx, attn = scaled_dot_product_attention(q, k, v, scale=scale, attn_mask=attn_mask)
    ctx = jax.block_until_ready(ctx)
    attn = jax.block_until_ready(attn)
    ctx_r, attn_r = _reference(q, k, v, scale=scale, attn_mask=attn_mask)
    assert jnp.allclose(ctx, ctx_r, atol=2e-3, rtol=2e-3), "context mismatch (masked)"
    assert jnp.allclose(attn, attn_r, atol=2e-3, rtol=2e-3), "attention mismatch (masked)"

    # Unmasked path (no mask tensor is DMA'd at all).
    ctx2, attn2 = scaled_dot_product_attention(q, k, v, scale=scale, attn_mask=None)
    ctx2 = jax.block_until_ready(ctx2)
    attn2 = jax.block_until_ready(attn2)
    ctx2_r, attn2_r = _reference(q, k, v, scale=scale, attn_mask=None)
    assert jnp.allclose(ctx2, ctx2_r, atol=2e-3, rtol=2e-3), "context mismatch (unmasked)"
    assert jnp.allclose(attn2, attn2_r, atol=2e-3, rtol=2e-3), "attention mismatch (unmasked)"

    # TODO(synk): attention_dropout > 0 (training-mode dropout with pltpu PRNG)
    # is not implemented; p=0.0 default makes it the identity here.
    print("KERNEL_OK")
</pallas_src>

<mosaic_0001>
module attributes {stable_mosaic.version = 11 : i64} {
  func.func @_sdpa_kernel(%arg0: i32, %arg1: i32, %arg2: memref<1x8x32xf32, #tpu.memory_space<vmem>>, %arg3: memref<1x8x32xf32, #tpu.memory_space<vmem>>, %arg4: memref<1x8x32xf32, #tpu.memory_space<vmem>>, %arg5: memref<1x8x8xi8, #tpu.memory_space<vmem>>, %arg6: memref<1x8x32xf32, #tpu.memory_space<vmem>>, %arg7: memref<1x8x8xf32, #tpu.memory_space<vmem>>) attributes {dimension_semantics = [#tpu.dimension_semantics<parallel>, #tpu.dimension_semantics<parallel>], iteration_bounds = array<i64: 2, 1>, scalar_prefetch = 0 : i64, scratch_operands = 0 : i64, tpu.core_type = #tpu.core_type<tc>, window_params = [{transform_indices = @transform_0, window_bounds = array<i64: 1, 8, 32>}, {transform_indices = @transform_1, window_bounds = array<i64: 1, 8, 32>}, {transform_indices = @transform_2, window_bounds = array<i64: 1, 8, 32>}, {transform_indices = @transform_3, window_bounds = array<i64: 1, 8, 8>}, {transform_indices = @transform_4, window_bounds = array<i64: 1, 8, 32>}, {transform_indices = @transform_5, window_bounds = array<i64: 1, 8, 8>}]} {
    %c0 = arith.constant 0 : index
    %c0_0 = arith.constant 0 : index
    %c0_1 = arith.constant 0 : index
    %0 = vector.load %arg2[%c0, %c0_0, %c0_1] : memref<1x8x32xf32, #tpu.memory_space<vmem>>, vector<1x8x32xf32>
    %1 = vector.shape_cast %0 : vector<1x8x32xf32> to vector<8x32xf32>
    %c0_2 = arith.constant 0 : index
    %c0_3 = arith.constant 0 : index
    %c0_4 = arith.constant 0 : index
    %2 = vector.load %arg3[%c0_2, %c0_3, %c0_4] : memref<1x8x32xf32, #tpu.memory_space<vmem>>, vector<1x8x32xf32>
    %3 = vector.shape_cast %2 : vector<1x8x32xf32> to vector<8x32xf32>
    %c0_5 = arith.constant 0 : index
    %c0_6 = arith.constant 0 : index
    %c0_7 = arith.constant 0 : index
    %4 = vector.load %arg4[%c0_5, %c0_6, %c0_7] : memref<1x8x32xf32, #tpu.memory_space<vmem>>, vector<1x8x32xf32>
    %5 = vector.shape_cast %4 : vector<1x8x32xf32> to vector<8x32xf32>
    %cst = arith.constant 0.176776692 : f32
    %6 = vector.broadcast %cst : f32 to vector<8x32xf32>
    %7 = arith.mulf %1, %6 : vector<8x32xf32>
    %cst_8 = arith.constant dense<0.000000e+00> : vector<8x8xf32>
    %8 = tpu.matmul %7, %3, %cst_8 {dimension_numbers = #tpu.dot_dimension_numbers<[1], [1], [0], [0], [0, 0, 1, 0], [], []>} : vector<8x32xf32>, vector<8x32xf32>, vector<8x8xf32> -> vector<8x8xf32>
    %c0_9 = arith.constant 0 : index
    %c0_10 = arith.constant 0 : index
    %c0_11 = arith.constant 0 : index
    %9 = vector.load %arg5[%c0_9, %c0_10, %c0_11] : memref<1x8x8xi8, #tpu.memory_space<vmem>>, vector<1x8x8xi8>
    %10 = vector.shape_cast %9 : vector<1x8x8xi8> to vector<8x8xi8>
    %c0_i8 = arith.constant 0 : i8
    %11 = vector.broadcast %c0_i8 : i8 to vector<8x8xi8>
    %12 = arith.cmpi ne, %10, %11 : vector<8x8xi8>
    %cst_12 = arith.constant -1.000000e+30 : f32
    %13 = vector.broadcast %cst_12 : f32 to vector<8x8xf32>
    %14 = arith.select %12, %13, %8 : vector<8x8xi1>, vector<8x8xf32>
    %cst_13 = arith.constant dense<0xFF800000> : vector<8xf32>
    %15 = vector.multi_reduction <maximumf>, %14, %cst_13 [1] : vector<8x8xf32> to vector<8xf32>
    %16 = vector.shape_cast %15 : vector<8xf32> to vector<8x1xf32>
    %17 = vector.broadcast %16 : vector<8x1xf32> to vector<8x8xf32>
    %18 = arith.subf %14, %17 : vector<8x8xf32>
    %19 = math.exp %18 : vector<8x8xf32>
    %cst_14 = arith.constant dense<0.000000e+00> : vector<8xf32>
    %20 = vector.multi_reduction <add>, %19, %cst_14 [1] : vector<8x8xf32> to vector<8xf32>
    %21 = vector.shape_cast %20 : vector<8xf32> to vector<8x1xf32>
    %22 = tpu.reciprocal %21 {approx = true} : vector<8x1xf32> -> vector<8x1xf32>
    %23 = vector.broadcast %22 : vector<8x1xf32> to vector<8x8xf32>
    %24 = arith.mulf %19, %23 : vector<8x8xf32>
    %cst_15 = arith.constant dense<0.000000e+00> : vector<8x32xf32>
    %25 = tpu.matmul %24, %5, %cst_15 {dimension_numbers = #tpu.dot_dimension_numbers<[1], [0], [0], [1], [0, 0, 1, 1], [], []>} : vector<8x8xf32>, vector<8x32xf32>, vector<8x32xf32> -> vector<8x32xf32>
    %c0_16 = arith.constant 0 : index
    %c0_17 = arith.constant 0 : index
    %c0_18 = arith.constant 0 : index
    %26 = vector.load %arg7[%c0_16, %c0_17, %c0_18] : memref<1x8x8xf32, #tpu.memory_space<vmem>>, vector<1x8x8xf32>
    %27 = vector.shape_cast %26 : vector<1x8x8xf32> to vector<8x8xf32>
    %28 = vector.shape_cast %24 : vector<8x8xf32> to vector<1x8x8xf32>
    tpu.vector_store %arg7[%c0_16, %c0_17, %c0_18], %28 {strides = array<i32>} : memref<1x8x8xf32, #tpu.memory_space<vmem>>, vector<1x8x8xf32>,
    %c0_19 = arith.constant 0 : index
    %c0_20 = arith.constant 0 : index
    %c0_21 = arith.constant 0 : index
    %29 = vector.load %arg6[%c0_19, %c0_20, %c0_21] : memref<1x8x32xf32, #tpu.memory_space<vmem>>, vector<1x8x32xf32>
    %30 = vector.shape_cast %29 : vector<1x8x32xf32> to vector<8x32xf32>
    %31 = vector.shape_cast %25 : vector<8x32xf32> to vector<1x8x32xf32>
    tpu.vector_store %arg6[%c0_19, %c0_20, %c0_21], %31 {strides = array<i32>} : memref<1x8x32xf32, #tpu.memory_space<vmem>>, vector<1x8x32xf32>,
    return
  }
  func.func @transform_0(%arg0: i32, %arg1: i32) -> (i32, i32, i32) {
    %c0_i32 = arith.constant 0 : i32
    %c0_i32_0 = arith.constant 0 : i32
    return %arg0, %arg1, %c0_i32 : i32, i32, i32
  }
  func.func @transform_1(%arg0: i32, %arg1: i32) -> (i32, i32, i32) {
    %c0_i32 = arith.constant 0 : i32
    %c0_i32_0 = arith.constant 0 : i32
    %c0_i32_1 = arith.constant 0 : i32
    return %arg0, %c0_i32, %c0_i32_0 : i32, i32, i32
  }
  func.func @transform_2(%arg0: i32, %arg1: i32) -> (i32, i32, i32) {
    %c0_i32 = arith.constant 0 : i32
    %c0_i32_0 = arith.constant 0 : i32
    %c0_i32_1 = arith.constant 0 : i32
    return %arg0, %c0_i32, %c0_i32_0 : i32, i32, i32
  }
  func.func @transform_3(%arg0: i32, %arg1: i32) -> (i32, i32, i32) {
    %c0_i32 = arith.constant 0 : i32
    %c0_i32_0 = arith.constant 0 : i32
    return %arg0, %arg1, %c0_i32 : i32, i32, i32
  }
  func.func @transform_4(%arg0: i32, %arg1: i32) -> (i32, i32, i32) {
    %c0_i32 = arith.constant 0 : i32
    %c0_i32_0 = arith.constant 0 : i32
    return %arg0, %arg1, %c0_i32 : i32, i32, i32
  }
  func.func @transform_5(%arg0: i32, %arg1: i32) -> (i32, i32, i32) {
    %c0_i32 = arith.constant 0 : i32
    %c0_i32_0 = arith.constant 0 : i32
    return %arg0, %arg1, %c0_i32 : i32, i32, i32
  }
}

</mosaic_0001>

<bundles_post_ra>
// kernel: tpu_custom_call.1
= control target key start
LH: loop header
LB: loop body
LE: loop exit
PB: predicated region body
PF: predicated region fallthrough
CT: control target
= control target key end

     0   :  { %s1271_s0 = inlined_call_operand.hbm [shape: f32[2,8,32], index: 0, kind: input, shape index: {}]   ;;  %s1272_s1 = inlined_call_operand.hbm [shape: f32[2,8,32], index: 1, kind: input, shape index: {}]   ;;  %s1273_s2 = inlined_call_operand.hbm [shape: f32[2,8,32], index: 2, kind: input, shape index: {}]   ;;  %s1274_s3 = inlined_call_operand.hbm [shape: s8[2,8,8], index: 3, kind: input, shape index: {}]   ;;  %s1275_s4 = inlined_call_operand.hbm [shape: f32[2,8,32], index: 4, kind: output, shape index: {0}]   ;;  %s1276_s5 = inlined_call_operand.hbm [shape: f32[2,8,8], index: 5, kind: output, shape index: {1}]  }
   0x1   :  { %1282 = sst [smem:[#allocation23_spill]] %s1271_s0 }
   0x2   :  { %1283 = sst [smem:[#allocation24_spill]] %s1272_s1 }
   0x3   :  { %11 = vsyncpa [#allocation3], 0 }
   0x4   :  { %13 = vsyncpa [#allocation3 + $0x1], 0 }
   0x5   :  { %14 = vsyncpa [#allocation6], 0 }
   0x6   :  { %16 = vsyncpa [#allocation6 + $0x1], 0 }
   0x7   :  { %17 = vsyncpa [#allocation9], 0 }
   0x8   :  { %19 = vsyncpa [#allocation9 + $0x1], 0 }
   0x9   :  { %20 = vsyncpa [#allocation4], 0 }
   0xa   :  { %22 = vsyncpa [#allocation4 + $0x1], 0 }
   0xb   :  { %23 = vsyncpa [#allocation12], 0 }
   0xc   :  { %25 = vsyncpa [#allocation12 + $0x1], 0  ;;  %s1073_s18 = smov 0   ;;  %s1075_s19 = smov 0  }
   0xd   :  { %s1077_s20 = smov 0   ;;  %s1079_s21 = smov 0  }
   0xe   :  { %s1081_s22 = smov 0   ;;  %s1083_s23 = smov 0  }
   0xf LB: > { %1284 = sst [smem:[#allocation18_spill]] %s1028_s20  ;;  %s1104_s24 = sadd.s32 4294967295, %s1040_s23   ;;  %s1040_s23 = sphi %s1083_s23, %s31_s23   ;;  %s1036_s22 = sphi %s1081_s22, %s1305_s22   ;;  %s1032_s21 = sphi %s1079_s21, %s1304_s21   ;;  %s1028_s20 = sphi %s1077_s20, %s1300_s20   ;;  %s1024_s19 = sphi %s1075_s19, %s1303_s19   ;;  %s1020_s18 = sphi %s1073_s18, %s1302_s18  }
  0x10   : > { %1285 = sst [smem:[#allocation19_spill]] %s1040_s23  ;;  %s684_s25 = sadd.s32 4294967294, %s1040_s23  }
  0x11   : > { %s43_s26 = sadd.s32 1, %s1036_s22  ;;  %s52_s27 = sadd.s32 1, %s1028_s20 }
  0x12   : > { %p45_p0 = scmp.ge.s32.totalorder %s43_s26, 2  ;;  %p59_p1 = scmp.ne.s32.totalorder %s1028_s20, %s1024_s19 }
  0x13   : > { %p60_p2 = scmp.eq.s32.totalorder %s1040_s23, 0  ;;  %p65_p3 = scmp.ne.s32.totalorder %s1024_s19, %s1020_s18 }
  0x14   : > { %s1307_s26 = smov (%p45_p0, %s43_s26), 0  ;;  %p66_p5 = scmp.eq.s32.totalorder %s1104_s24, 0 }
  0x15   : > { %1286 = sst [smem:[#allocation20_spill]] %s1307_s26  ;;  %p1116_p4 = por %p60_p2, %p59_p1 }
  0x16   : > { %s47_s29 = ssub.s32 %s1036_s22, %s1307_s26  ;;  %p171_p6 = scmp.eq.s32.totalorder %s1104_s24, 1 }
  0x17   : > { %p50_p7 = scmp.eq.s32.totalorder %s47_s29, 0  ;;  %p1124_p8 = por %p66_p5, %p65_p3 }
  0x18   : > { %p1128_p9 = por %p171_p6, %p59_p1  ;;  %p177_p10 = scmp.eq.s32.totalorder %s684_s25, 1 }
  0x19   : > { %s1133_s7 = scalar_select %p50_p7, %s1028_s20, %s52_s27  }
  0x1a   : > { %p1135_p11 = por %p177_p10, %p65_p3  ;;  %p686_p12 = scmp.ge.s32.totalorder %s1040_s23, 2 }
  0x1b   : > { %1290 = sst [smem:[#allocation21_spill]] %s1133_s7  ;;  %p743_p13 = scmp.lt.s32.totalorder %s1040_s23, 2 }
  0x1c   : > { %s1291_s8 = scalar_select %p1135_p11, 1, 0 }
  0x1d   : > { %s1142_s9 = sand.u32 1, %s1028_s20   ;;  %s688_s11 = sshll.u32 %s1036_s22, 3 }
  0x1e   : > { %1292 = sst [smem:[#allocation22_spill]] %s1291_s8  ;;  %s687_s10 = sshll.u32 %s1142_s9, 3 }
  0x1f   : > { %p1148_p0 = pnand %p743_p13, %p1116_p4  ;;  %s245_s13 = sand.u32 1, %s1040_s23  }
  0x20   : > { %s1294_s1 = sld [smem:[#allocation24_spill]]  ;;  %s249_s25 = scalar_lea.vmem [#allocation5], %s687_s10 }
  0x21   : > { %s257_s27 = sshll.u32 %s249_s25, 4  ;;  %s246_s29 = scalar_lea.sflag [#allocation6], %s245_s13  ;;  %s258_s27 = int_to_ptr.vmem [resolvable:$true] %s257_s27 }
  0x22   : > { %p695_p1 = scmp.ge.s32.totalorder %s1040_s23, 1  ;;  %p301_p2 = scmp.lt.s32.totalorder %s1040_s23, 3 }
  0x23   : > { %s1296_s0 = sld [smem:[#allocation23_spill]]  ;;  %s229_s25 = scalar_lea.vmem [#allocation2], %s687_s10 }
  0x24   : > { %p1160_p3 = pnand %p695_p1, %p301_p2  ;;  %s226_s13 = scalar_lea.sflag [#allocation3], %s1142_s9 }
  0x25   : > { %s272_s7 = scalar_lea.hbm %s1273_s2, %s688_s11  ;;  %s268_s23 = scalar_lea.vmem [#allocation7], %s687_s10 }
  0x26   : > { %s253_s16 = scalar_lea.hbm %s1294_s1, %s688_s11  ;;  %s238_s1 = sshll.u32 %s229_s25, 4  ;;  %s239_s1 = int_to_ptr.vmem [resolvable:$true] %s238_s1 }
  0x27   : > { %s255_s17 = sshll.u32 %s253_s16, 4  ;;  %s274_s20 = sshll.u32 %s272_s7, 4  ;;  %s256_s17 = int_to_ptr.hbm [resolvable:$true] %s255_s17  ;;  %s275_s20 = int_to_ptr.hbm [resolvable:$true] %s274_s20 }
  0x28   : > { %729 = dma.hbm_to_vmem [thread:$0]  (!%p1148_p0), %s256_s17, 128, %s258_s27, %s246_s29  }
  0x29   : > { %s234_s15 = scalar_lea.hbm %s1296_s0, %s688_s11  ;;  %s276_s26 = sshll.u32 %s268_s23, 4  ;;  %s277_s26 = int_to_ptr.vmem [resolvable:$true] %s276_s26 }
  0x2a   : > { %s236_s16 = sshll.u32 %s234_s15, 4  ;;  %s693_s14 = sshll.u32 %s1142_s9, 1  ;;  %s237_s16 = int_to_ptr.hbm [resolvable:$true] %s236_s16 }
  0x2b   : > { %726 = dma.hbm_to_vmem [thread:$0]  (!%p1148_p0), %s237_s16, 128, %s239_s1, %s226_s13  }
  0x2c   : > { %732 = dma.hbm_to_vmem [thread:$0]  (!%p1148_p0), %s275_s20, 128, %s277_s26, %s246_s29  }
  0x2d   : > { %s694_s15 = sshll.u32 %s1036_s22, 1  ;;  %s287_s1 = scalar_lea.vmem [#allocation8], %s693_s14 }
  0x2e   : > { %s292_s8 = scalar_lea.hbm %s1274_s3, %s694_s15  ;;  %s296_s16 = sshll.u32 %s287_s1, 4  ;;  %s297_s16 = int_to_ptr.vmem [resolvable:$true] %s296_s16 }
  0x2f   : > { %s294_s13 = sshll.u32 %s292_s8, 4  ;;  %s284_s11 = scalar_lea.sflag [#allocation9], %s1142_s9  ;;  %s295_s13 = int_to_ptr.hbm [resolvable:$true] %s294_s13 }
  0x30   : > { %735 = dma.hbm_to_vmem [thread:$0]  (!%p1148_p0), %s295_s13, 32, %s297_s16, %s284_s11  }
  0x31   : > { %305 = sbr.rel (%p1160_p3) target bundleno = 575 (0x23f), region = 36  ;;  %s1186_s20 = sand.u32 (!%p1160_p3), 1, %s1024_s19  }
  0x32   : > { %s1189_s23 = sshll.u32 (!%p1160_p3), %s1186_s20, 3  ;;  %s308_s0 = scalar_lea.sflag (!%p1160_p3), [#allocation3], %s1186_s20 }
  0x33   : > { %s311_s7 = scalar_lea.vmem (!%p1160_p3), [#allocation2], %s1189_s23 }
  0x36   : > { %999 = dma.done.wait (%p1124_p8), %s308_s0, 128  }
  0x37   : > { %1001 = vsyncadd (%p1124_p8), %s308_s0, 4294967168  ;;  %s317_s8 = sand.u32 1, %s1104_s24   ;;  %s321_s10 = scalar_lea.vmem [#allocation5], %s1189_s23 }
  0x38   : > { %s318_s9 = scalar_lea.sflag [#allocation6], %s317_s8 }
  0x39   : > { %1003 = dma.done.wait (%p1124_p8), %s318_s9, 256  }
  0x3a   : > { %1005 = vsyncadd (%p1124_p8), %s318_s9, 4294967040  ;;  %s699_s12 = sshll.u32 %s1186_s20, 1  ;;  %s331_s29 = scalar_lea.vmem [#allocation7], %s1189_s23 }
  0x3b   : > { %s338_s28 = scalar_lea.sflag [#allocation9], %s1186_s20  ;;  %s341_s17 = scalar_lea.vmem [#allocation8], %s699_s12 }
  0x3c   : > { %1007 = dma.done.wait (%p1124_p8), %s338_s28, 32  }
  0x3d   : > { %1009 = vsyncadd (%p1124_p8), %s338_s28, 4294967264  ;;  %vm395_vm0 = vcmask 261120   ;;  %v392_v0 = vld [vmem:[%s321_s10] sm:$0xff]  ;;  %v391_v1 = vld [vmem:[%s311_s7] sm:$0xff]  ;;  %v1042_v4 = vmov 0   ;;  %vm428_vm3 = vcmask 64512  }
  0x3e   : > { %702 = vmatpush.xpose.msk.msra.mxu0 %vm395_vm0, %v392_v0  ;;  %v394_v2 = vmul.f32 0.17677669, %v391_v1  ;;  %v422_v3 = vld [vmem:[%s341_s17] sm:$0x3]  ;;  %v393_v15 = vld [vmem:[%s331_s29] sm:$0xff]  ;;  %s707_s24 = sshll.u32 %s1032_s21, 3 }
  0x3f   : > { %vm423_vm1 = vnez %v422_v3  ;;  %458 = vmatpush.msra.mxu1 %v393_v15  ;;  %s497_s26 = scalar_lea.hbm %s1276_s5, %s707_s24  ;;  %s388_s14 = scalar_lea.vmem [#allocation11], %s1189_s23 }
  0x40   : > { %v424_v5 = vsel %vm423_vm1, 16843009, %v1042_v4  ;;  %s499_s15 = sshll.u32 %s388_s14, 4  ;;  %s501_s25 = sshll.u32 %s497_s26, 4  ;;  %s500_s15 = int_to_ptr.vmem [resolvable:$true] %s499_s15  ;;  %s502_s25 = int_to_ptr.hbm [resolvable:$true] %s501_s25 }
  0x41   : > { %703 = vmatmul.msk.f32.vlgmr.msra.gmra.mxu0 %vm395_vm0, %v394_v2  ;;  %v425_v6 = vunpack.c.0.s8 %v424_v5  ;;  %s471_s1 = scalar_lea.sflag [#allocation12], %s1186_s20  ;;  %s932_s16 = sshra.s32 %s502_s25, 4  ;;  %s933_s16 = int_to_ptr.hbm [resolvable:$true] %s932_s16 }
  0x42   : > { %s934_s21 = scalar_lea.hbm %s933_s16, 8  ;;  %s938_s0 = scalar_lea.hbm %s1276_s5, 16 }
  0x43   : > { %vm426_vm2 = vcmp.ne.s32.totalorder %v425_v6, 0  ;;  %p935_p4 = scmp.ne.s32.totalorder %s933_s16, %s934_s21  ;;  %p939_p7 = scmp.lt.s32.totalorder %s933_s16, %s1276_s5 }
  0x44   : > { %p940_p8 = scmp.lt.s32.totalorder %s938_s0, %s934_s21 }
  0x45   : > { %p936_p5 = pnand %p935_p4, %p1128_p9 }
  0x46   : > { %p941_p10 = por %p940_p8, %p939_p7 }
  0x47   : > { %p937_p6 = pneg %p936_p5 }
  0x49   : > { %p942_p13 = pnand %p941_p10, %p937_p6 }
  0xbe   : > { %v419_v7 = vpop.f32.mrf.mxu0 }
  0xbf   : > { %v427_v8 = vsel %vm426_vm2, -1e+30, %v419_v7 }
  0xc0   : > { %v429_v9 = vsel %vm428_vm3, %v427_v8, -inf }
  0xc1   : > { %430 = vmax.xlane.f32.xlu0 %v429_v9 }
 0x134   : > { %v431_v10 = vpop.xlane.xlu0 %430 }
 0x135   : > { %v432_v11 = vsub.f32 %v427_v8, %v431_v10 }
 0x137   : > { %v433_v12 = vmul.f32 1.442695, %v432_v11 }
 0x139   : > { %794 = vpow2.f32 %v433_v12 }
 0x13f   : > { %v795_v13 = vpop.eup %794 }
 0x140   : > { %v435_v14 = vsel %vm428_vm3, %v795_v13, 0.0 }
 0x141   : > { %436 = vadd.xlane.f32.xlu0 %v435_v14 }
 0x1b4   : > { %v437_v16 = vpop.xlane.xlu0 %436 }
 0x1b5   : > { %796 = vrcp.f32 %v437_v16 }
 0x1bb   : > { %v797_v17 = vpop.eup %796 }
 0x1bc   : > { %v439_v18 = vmul.f32 %v797_v17, %v795_v13 }
 0x1be   : > { %704 = vmatmul.msk.f32.vlgmr.msra.gmra.mxu1 %vm428_vm3, %v439_v18  ;;  %463 = vst.msk [vmem:[%s388_s14] sm:$0xff] %vm428_vm3, %v439_v18 }
 0x1bf   : > { %945 = shalt.err (!%p942_p13)
}
 0x1c0   : > { %720 = dma.vmem_to_hbm [thread:$0]  (%p1128_p9), %s500_s15, 128, %s502_s25, %s471_s1  }
 0x1c1   : > { %s482_s12 = scalar_lea.hbm %s1275_s4, %s707_s24  ;;  %s381_s29 = scalar_lea.vmem [#allocation10], %s1189_s23 }
 0x1c2   : > { %s484_s28 = sshll.u32 %s381_s29, 4  ;;  %s486_s17 = sshll.u32 %s482_s12, 4  ;;  %s485_s28 = int_to_ptr.vmem [resolvable:$true] %s484_s28  ;;  %s487_s17 = int_to_ptr.hbm [resolvable:$true] %s486_s17 }
 0x1c3   : > { %s466_s30 = scalar_lea.sflag [#allocation4], %s1186_s20  ;;  %s960_s27 = sshra.s32 %s487_s17, 4  ;;  %s961_s27 = int_to_ptr.hbm [resolvable:$true] %s960_s27 }
 0x1c4   : > { %s962_s26 = scalar_lea.hbm %s961_s27, 8  ;;  %s966_s24 = scalar_lea.hbm %s1275_s4, 16 }
 0x1c5   : > { %p963_p0 = scmp.ne.s32.totalorder %s961_s27, %s962_s26  ;;  %p967_p3 = scmp.lt.s32.totalorder %s961_s27, %s1275_s4 }
 0x1c6   : > { %p968_p4 = scmp.lt.s32.totalorder %s966_s24, %s962_s26 }
 0x1c7   : > { %p964_p1 = pnand %p963_p0, %p1128_p9 }
 0x1c8   : > { %p969_p5 = por %p968_p4, %p967_p3 }
 0x1c9   : > { %p965_p2 = pneg %p964_p1 }
 0x1cb   : > { %p970_p6 = pnand %p969_p5, %p965_p2 }
 0x23b   : > { %v460_v19 = vpop.f32.mrf.mxu1 }
 0x23c   : > { %464 = vst.msk [vmem:[%s381_s29] sm:$0xff] %vm395_vm0, %v460_v19 }
 0x23d   : > { %973 = shalt.err (!%p970_p6)
}
 0x23e   : > { %719 = dma.vmem_to_hbm [thread:$0]  (%p1128_p9), %s485_s28, 128, %s487_s17, %s466_s30  }
 0x23f PF: > { %s1298_s1 = sld [smem:[#allocation19_spill]]  ;;  %s513_s16 = sand.u32 1, %s1020_s18  }
 0x240   : > { %p737_p7 = pnand %p686_p12, %p1135_p11  ;;  %s514_s21 = scalar_lea.sflag [#allocation4], %s513_s16 }
 0x242   : > { %p738_p8 = pneg %p737_p7 }
 0x244   : > { %1011 = dma.done.wait (%p738_p8), %s514_s21, 128  }
 0x245   : > { %1013 = vsyncadd (%p738_p8), %s514_s21, 4294967168  ;;  %s524_s13 = scalar_lea.sflag [#allocation12], %s513_s16 }
 0x246   : > { %1015 = dma.done.wait (%p738_p8), %s524_s13, 128  }
 0x247   : > { %1017 = vsyncadd (%p738_p8), %s524_s13, 4294967168  ;;  %s31_s23 = sadd.s32 1, %s1298_s1   ;;  %s1299_s6 = sld [smem:[#allocation18_spill]] }
 0x248   : > { %p28_p10 = scmp.ge.s32.totalorder %s31_s23, 4   ;;  %s1300_s20 = sld [smem:[#allocation21_spill]] }
 0x249   : > { %s1301_s11 = sld [smem:[#allocation20_spill]]  ;;  %s1302_s18 = smov %s1024_s19 }
 0x24a   : > { %s1304_s21 = smov %s1036_s22 }
 0x24b   :  { %30 = sbr.rel (!%p28_p10) target bundleno = 15 (0xf), region = 135 }
 0x24d   : > { %s1303_s19 = smov %s1299_s6 }
 0x24f   : > { %s1305_s22 = smov %s1301_s11 }
 0x250   :  { %530 = vsyncpa [#allocation3], 1 }
 0x251   :  { %532 = vsyncpa [#allocation3 + $0x1], 1 }
 0x252   :  { %533 = vsyncpa [#allocation6], 1 }
 0x253   :  { %535 = vsyncpa [#allocation6 + $0x1], 1 }
 0x254   :  { %536 = vsyncpa [#allocation9], 1 }
 0x255   :  { %538 = vsyncpa [#allocation9 + $0x1], 1 }
 0x256   :  { %539 = vsyncpa [#allocation4], 1 }
 0x257   :  { %541 = vsyncpa [#allocation4 + $0x1], 1 }
 0x258   :  { %542 = vsyncpa [#allocation12], 1 }
 0x259   :  { %544 = vsyncpa [#allocation12 + $0x1], 1 }

</bundles_post_ra>
